<compile_context>
chip_gen: v7x
topology: tpu7x:2x2x1
jax: 0.10.0
libtpu: 0.0.40
codegen_flags: <defaults>
</compile_context>

<pallas_src>
import functools
from typing import Any, NamedTuple, Tuple

import jax
import jax.numpy as jnp
from jax.experimental import pallas as pl
from jax.experimental.pallas import tpu as pltpu

_LANE = 128     # lane (last-dim) granule
_SUBLANE = 8    # sublane (second-to-last dim) granule for f32


def _round_up(x, m):
    return (x + m - 1) // m * m


def _const_index(i):
    return (0, 0)


def _resident_spec(shape):
    """BlockSpec for a grid-invariant (resident) block.

    Single-buffered: the block never changes across the grid, so the default
    double-buffering would only waste VMEM (halving how wide an MLP stays
    fully resident, the decisive constraint on v7x's 64 MiB VMEM).
    """
    try:
        return pl.BlockSpec(shape, _const_index, pipeline_mode=pl.Buffered(1))
    except (AttributeError, TypeError):   # older jax without pipeline_mode
        return pl.BlockSpec(shape, _const_index)


def _tpu_generation_info():
    """Returns (vmem_capacity_bytes, tensorcores_per_chip); failure-safe."""
    vmem = 128 * 2**20
    cores = 0
    try:
        info = pltpu.get_tpu_info()
        vmem = int(getattr(info, "vmem_capacity_bytes", vmem))
        cores = int(getattr(info, "num_cores", 0) or 0)
    except Exception:
        pass
    if cores <= 0:
        # Heuristic: v7x exposes 64 MiB VMEM per TensorCore and has 2 TCs/chip;
        # v5e / v6e have 128 MiB and a single TC.
        cores = 2 if vmem <= 64 * 2**20 else 1
    return vmem, cores


def _pick_row_tile(M, num_cores):
    """Pick the row tile tm and the padded row count Mp."""
    Mp = _round_up(max(M, 1), _SUBLANE)
    if Mp >= 1024:
        tm = 512            # big batches: amortize ~0.35 us/step, keep MXU M full
    elif Mp >= 256:
        tm = 256
    elif Mp >= 128:
        tm = 128            # 128-row granule keeps v5e's 4x128x128 MXUs full
    else:
        tm = Mp
    if num_cores >= 2 and Mp > _SUBLANE:
        # v7x megacore: make sure the "parallel" row axis has >= 2 grid steps.
        tm = min(tm, _round_up(pl.cdiv(Mp, 2), _SUBLANE))
    Mp = _round_up(Mp, tm)  # cdiv-style padding: no rows dropped
    return tm, Mp


class PreparedMLP(NamedTuple):
    padded_params: Tuple    # ((w_p[Kp,Np], bgb_p[3,Np]), ...) -- bgb rows: bias, gamma, beta
    layer_cfg: Tuple        # ((n_logical, n_pad, use_norm, apply_act), ...)
    in_feats: int
    n_out: int
    compute_dtype: Any


def prepare_mlp_params(params, *, use_norm=True, compute_dtype=jnp.float32):
    """One-time padding / packing / casting of MLP parameters.

    Call once and reuse across forward calls (avoids re-materializing padded
    HBM weight copies per inference call).

    INVARIANT: every padded weight / bias / gamma / beta entry is exactly zero.
    The masked LayerNorm and the padded-K matmul both rely on this; do not
    change the zero-init below.
    """
    n_layers = len(params)
    padded = []
    layer_cfg = []
    for li, (w, b, g, beta) in enumerate(params):
        k, n = w.shape
        kp, np_ = _round_up(k, _LANE), _round_up(n, _LANE)
        w_p = jnp.zeros((kp, np_), compute_dtype).at[:k, :n].set(
            w.astype(compute_dtype))
        bgb = jnp.zeros((3, np_), jnp.float32)
        bgb = bgb.at[0, :n].set(b.reshape(-1))      # bias
        bgb = bgb.at[1, :n].set(g.reshape(-1))      # LayerNorm gamma
        bgb = bgb.at[2, :n].set(beta.reshape(-1))   # LayerNorm beta
        padded.append((w_p, bgb))
        is_last = li == n_layers - 1
        layer_cfg.append((n, np_, bool(use_norm) and not is_last, not is_last))
    return PreparedMLP(tuple(padded), tuple(layer_cfg),
                       params[0][0].shape[0], params[-1][0].shape[1],
                       jnp.dtype(compute_dtype))


def fused_mlp_kernel(x_ref, *refs, layer_cfg, eps, act_dtype):
    """Whole-MLP forward for one row tile, entirely in VMEM.

    refs = (w0, bgb0, w1, bgb1, ..., out_ref); bgb rows are (bias, gamma, beta).
    Feature dims are zero-padded to 128 lanes.  Masked LayerNorm correctness
    relies on padded columns of weights/bias/gamma/beta being exactly zero.
    """
    o_ref = refs[-1]
    p_refs = refs[:-1]
    n_layers = len(layer_cfg)
    mask_cache = {}

    h = x_ref[...]                                       # (tm, Kp) activations
    for li, (n_logical, n_pad, use_norm, apply_act) in enumerate(layer_cfg):
        w_ref, bgb_ref = p_refs[2 * li], p_refs[2 * li + 1]
        # MXU matmul; f32 accumulation regardless of the storage dtype.
        acc = jnp.dot(h, w_ref[...], preferred_element_type=jnp.float32)
        acc = acc + bgb_ref[0:1, :]                      # bias (f32, zero-padded)

        if use_norm:
            # LayerNorm over the logical feature width (padded cols of acc are 0).
            inv_n = jnp.float32(1.0 / n_logical)
            mu = jnp.sum(acc, axis=-1, keepdims=True) * inv_n
            cent = acc - mu
            if n_logical != n_pad:                       # static: skip when aligned
                key = (n_logical, n_pad)
                if key not in mask_cache:
                    col = jax.lax.broadcasted_iota(jnp.int32, (1, n_pad), 1)
                    mask_cache[key] = (col < n_logical).astype(jnp.float32)
                cent = cent * mask_cache[key]
            var = jnp.sum(cent * cent, axis=-1, keepdims=True) * inv_n
            acc = cent * jax.lax.rsqrt(var + jnp.float32(eps))
            acc = acc * bgb_ref[1:2, :] + bgb_ref[2:3, :]   # gamma / beta

        if apply_act:
            acc = jnp.maximum(acc, 0.0)                  # ReLU
        # TODO(synk): dropout is identity (eval mode); training-mode dropout
        # would need pltpu.prng_seed / prng_random_bits masking here.

        # One cast per layer: keep inter-layer activations in the compute dtype
        # (bf16 path halves LHS vreg pressure); final logits stay f32 until store.
        h = acc.astype(act_dtype) if li != n_layers - 1 else acc

    o_ref[...] = h.astype(o_ref.dtype)


def mlp_forward_fused(x, prep: PreparedMLP, *, eps=1e-5):
    """Run the whole MLP as one fused Pallas kernel on pre-padded params."""
    M, K = x.shape
    assert K == prep.in_feats, (K, prep.in_feats)
    act_dtype = prep.compute_dtype
    out_dtype = x.dtype

    vmem_cap, num_cores = _tpu_generation_info()
    tm, Mp = _pick_row_tile(M, num_cores)

    Kp0 = prep.padded_params[0][0].shape[0]
    Np_last = prep.padded_params[-1][0].shape[1]

    # Only the input is padded per call (params were prepared once, up front).
    x_pad = jnp.zeros((Mp, Kp0), act_dtype).at[:M, :K].set(x.astype(act_dtype))

    flat_inputs = [x_pad]
    in_specs = [pl.BlockSpec((tm, Kp0), lambda i: (i, 0))]
    for w_p, bgb_p in prep.padded_params:
        kp, npd = w_p.shape
        flat_inputs += [w_p, bgb_p]
        in_specs += [_resident_spec((kp, npd)),      # full weight, resident, 1 buf
                     _resident_spec((3, npd))]       # packed bias/gamma/beta, 1 buf

    # ---- generation-aware VMEM budget ---------------------------------------
    need = 2 * tm * Kp0 * jnp.dtype(act_dtype).itemsize          # x tile (2 bufs)
    need += 2 * tm * Np_last * jnp.dtype(out_dtype).itemsize     # out tile (2 bufs)
    for w_p, _ in prep.padded_params:
        kp, npd = w_p.shape
        need += kp * npd * jnp.dtype(w_p.dtype).itemsize          # weight, 1 buf
        need += _round_up(3, _SUBLANE) * npd * 4                  # packed bgb, 1 buf
    max_w = max([Kp0] + [w.shape[1] for w, _ in prep.padded_params])
    need += 2 * tm * max_w * 4                                    # live f32 activations
    need += 2 * 2**20                                             # compiler scratch headroom

    cap = int(vmem_cap * 0.85)     # ~54 MiB on v7x, ~108 MiB on v5e/v6e
    if need > cap:
        # TODO(synk): add a K-tiled / per-layer streaming fallback (grid axis
        # marked "arbitrary" with a VMEM accumulator) for MLPs whose resident
        # weights exceed VMEM -- mainly a v7x (64 MiB) concern for >2k widths.
        raise ValueError(
            f"fused MLP needs ~{need >> 20} MiB VMEM but only {cap >> 20} MiB is "
            "budgetable on this chip; use bf16 weights or a K-tiled variant.")
    vmem_limit = int(min(max(int(1.25 * need), 4 * 2**20), cap))

    kernel = functools.partial(fused_mlp_kernel, layer_cfg=prep.layer_cfg,
                               eps=float(eps), act_dtype=act_dtype)
    out = pl.pallas_call(
        kernel,
        out_shape=jax.ShapeDtypeStruct((Mp, Np_last), out_dtype),
        grid=(Mp // tm,),
        in_specs=in_specs,
        out_specs=pl.BlockSpec((tm, Np_last), lambda i: (i, 0)),
        compiler_params=pltpu.CompilerParams(
            dimension_semantics=("parallel",),
            vmem_limit_bytes=vmem_limit),
    )(*flat_inputs)
    return out[:M, :prep.n_out]


def init_mlp_params(key, in_feats, hiddens, n_classes):
    """Deterministic synthetic parameters matching nn.Linear / nn.LayerNorm shapes."""
    dims = [in_feats] + hiddens + [n_classes]
    params = []
    for i in range(len(dims) - 1):
        key, kw, kb = jax.random.split(key, 3)
        fan_in = dims[i]
        bound = 1.0 / jnp.sqrt(fan_in)
        # stored as [in, out] (transpose of torch's [out, in])
        w = jax.random.uniform(kw, (dims[i], dims[i + 1]),
                               jnp.float32, -bound, bound)
        b = jax.random.uniform(kb, (1, dims[i + 1]), jnp.float32, -bound, bound)
        gamma = jnp.ones((1, dims[i + 1]), jnp.float32)   # LayerNorm weight
        beta = jnp.zeros((1, dims[i + 1]), jnp.float32)   # LayerNorm bias
        params.append((w, b, gamma, beta))
    return params


def mlp_reference(features, params, *, use_norm=True, eps=1e-5):
    """Pure-JAX f32 reference for correctness checking."""
    h = features
    for i in range(len(params) - 1):
        w, b, g, beta = params[i]
        h = h @ w + b
        if use_norm:
            mu = jnp.mean(h, axis=-1, keepdims=True)
            var = jnp.mean((h - mu) ** 2, axis=-1, keepdims=True)
            h = (h - mu) * jax.lax.rsqrt(var + eps) * g + beta
        h = jnp.maximum(h, 0.0)
    w, b, g, beta = params[-1]
    return h @ w + b


if __name__ == "__main__":
    # MLP(in_feats=16, hiddens=[32, 64], n_classes=8, activation=ReLU,
    #     dropout=0.5, batch_norm=True, norm_type='ln'), eval mode.
    # TODO(synk): norm_type='bn' (BatchNorm1d) path is not implemented.
    batch, in_feats, hiddens, n_classes = 8, 16, [32, 64], 8

    key = jax.random.PRNGKey(0)
    key, kx = jax.random.split(key)
    x = jax.random.normal(kx, (batch, in_feats), jnp.float32)
    params = init_mlp_params(key, in_feats, hiddens, n_classes)

    ref = mlp_reference(x, params, use_norm=True)

    # f32 path: tight check against the pure-JAX reference.
    prep_f32 = prepare_mlp_params(params, use_norm=True,
                                  compute_dtype=jnp.float32)
    logits = mlp_forward_fused(x, prep_f32)
    logits = jax.block_until_ready(logits)
    assert logits.shape == (batch, n_classes)
    assert jnp.allclose(logits, ref, atol=1e-4, rtol=1e-4), "f32 mismatch vs reference"

    # bf16 weight + activation storage (f32 MXU accumulation, f32 LN epilogue):
    # 2x MXU throughput, half the weight footprint and activation DMA bytes.
    prep_bf16 = prepare_mlp_params(params, use_norm=True,
                                   compute_dtype=jnp.bfloat16)
    logits_bf16 = mlp_forward_fused(x, prep_bf16)
    logits_bf16 = jax.block_until_ready(logits_bf16)
    assert logits_bf16.shape == (batch, n_classes)
    assert jnp.allclose(logits_bf16, ref, atol=1.5e-1, rtol=5e-2), \
        "bf16 mismatch vs reference"

    print("KERNEL_OK")
</pallas_src>

<mosaic_0001>
module attributes {stable_mosaic.version = 11 : i64} {
  func.func @fused_mlp_kernel(%arg0: i32, %arg1: memref<8x128xf32, #tpu.memory_space<vmem>>, %arg2: memref<128x128xf32, #tpu.memory_space<vmem>>, %arg3: memref<3x128xf32, #tpu.memory_space<vmem>>, %arg4: memref<128x128xf32, #tpu.memory_space<vmem>>, %arg5: memref<3x128xf32, #tpu.memory_space<vmem>>, %arg6: memref<128x128xf32, #tpu.memory_space<vmem>>, %arg7: memref<3x128xf32, #tpu.memory_space<vmem>>, %arg8: memref<8x128xf32, #tpu.memory_space<vmem>>) attributes {dimension_semantics = [#tpu.dimension_semantics<parallel>], iteration_bounds = array<i64: 1>, scalar_prefetch = 0 : i64, scratch_operands = 0 : i64, tpu.core_type = #tpu.core_type<tc>, window_params = [{transform_indices = @transform_0, window_bounds = array<i64: 8, 128>}, {pipeline_mode = #tpu.pipeline_mode<synchronous>, transform_indices = @transform_1, window_bounds = array<i64: 128, 128>}, {pipeline_mode = #tpu.pipeline_mode<synchronous>, transform_indices = @transform_2, window_bounds = array<i64: 3, 128>}, {pipeline_mode = #tpu.pipeline_mode<synchronous>, transform_indices = @transform_3, window_bounds = array<i64: 128, 128>}, {pipeline_mode = #tpu.pipeline_mode<synchronous>, transform_indices = @transform_4, window_bounds = array<i64: 3, 128>}, {pipeline_mode = #tpu.pipeline_mode<synchronous>, transform_indices = @transform_5, window_bounds = array<i64: 128, 128>}, {pipeline_mode = #tpu.pipeline_mode<synchronous>, transform_indices = @transform_6, window_bounds = array<i64: 3, 128>}, {transform_indices = @transform_7, window_bounds = array<i64: 8, 128>}]} {
    %c0 = arith.constant 0 : index
    %c0_0 = arith.constant 0 : index
    %0 = vector.load %arg1[%c0, %c0_0] : memref<8x128xf32, #tpu.memory_space<vmem>>, vector<8x128xf32>
    %c0_1 = arith.constant 0 : index
    %c0_2 = arith.constant 0 : index
    %1 = vector.load %arg2[%c0_1, %c0_2] : memref<128x128xf32, #tpu.memory_space<vmem>>, vector<128x128xf32>
    %cst = arith.constant dense<0.000000e+00> : vector<8x128xf32>
    %2 = tpu.matmul %0, %1, %cst {dimension_numbers = #tpu.dot_dimension_numbers<[1], [0], [0], [1], [0, 0, 1, 1], [], []>} : vector<8x128xf32>, vector<128x128xf32>, vector<8x128xf32> -> vector<8x128xf32>
    %c0_3 = arith.constant 0 : index
    %c0_4 = arith.constant 0 : index
    %3 = vector.load %arg3[%c0_3, %c0_4] : memref<3x128xf32, #tpu.memory_space<vmem>>, vector<1x128xf32>
    %4 = vector.broadcast %3 : vector<1x128xf32> to vector<8x128xf32>
    %5 = arith.addf %2, %4 : vector<8x128xf32>
    %cst_5 = arith.constant dense<0.000000e+00> : vector<8xf32>
    %6 = vector.multi_reduction <add>, %5, %cst_5 [1] : vector<8x128xf32> to vector<8xf32>
    %7 = vector.shape_cast %6 : vector<8xf32> to vector<8x1xf32>
    %cst_6 = arith.constant 3.125000e-02 : f32
    %8 = vector.broadcast %cst_6 : f32 to vector<8x1xf32>
    %9 = arith.mulf %7, %8 : vector<8x1xf32>
    %10 = vector.broadcast %9 : vector<8x1xf32> to vector<8x128xf32>
    %11 = arith.subf %5, %10 : vector<8x128xf32>
    %12 = tpu.iota {dimensions = array<i32: 1>} : vector<1x128xi32>
    %c32_i32 = arith.constant 32 : i32
    %13 = vector.broadcast %c32_i32 : i32 to vector<1x128xi32>
    %14 = arith.cmpi slt, %12, %13 : vector<1x128xi32>
    %15 = arith.extui %14 : vector<1x128xi1> to vector<1x128xi32>
    %16 = arith.sitofp %15 : vector<1x128xi32> to vector<1x128xf32>
    %17 = vector.broadcast %16 : vector<1x128xf32> to vector<8x128xf32>
    %18 = arith.mulf %11, %17 : vector<8x128xf32>
    %19 = arith.mulf %18, %18 : vector<8x128xf32>
    %cst_7 = arith.constant dense<0.000000e+00> : vector<8xf32>
    %20 = vector.multi_reduction <add>, %19, %cst_7 [1] : vector<8x128xf32> to vector<8xf32>
    %21 = vector.shape_cast %20 : vector<8xf32> to vector<8x1xf32>
    %cst_8 = arith.constant 3.125000e-02 : f32
    %22 = vector.broadcast %cst_8 : f32 to vector<8x1xf32>
    %23 = arith.mulf %21, %22 : vector<8x1xf32>
    %cst_9 = arith.constant 9.99999974E-6 : f32
    %24 = vector.broadcast %cst_9 : f32 to vector<8x1xf32>
    %25 = arith.addf %23, %24 : vector<8x1xf32>
    %26 = math.rsqrt %25 : vector<8x1xf32>
    %27 = vector.broadcast %26 : vector<8x1xf32> to vector<8x128xf32>
    %28 = arith.mulf %18, %27 : vector<8x128xf32>
    %c1 = arith.constant 1 : index
    %c0_10 = arith.constant 0 : index
    %29 = vector.load %arg3[%c1, %c0_10] : memref<3x128xf32, #tpu.memory_space<vmem>>, vector<1x128xf32>
    %30 = vector.broadcast %29 : vector<1x128xf32> to vector<8x128xf32>
    %31 = arith.mulf %28, %30 : vector<8x128xf32>
    %c2 = arith.constant 2 : index
    %c0_11 = arith.constant 0 : index
    %32 = vector.load %arg3[%c2, %c0_11] : memref<3x128xf32, #tpu.memory_space<vmem>>, vector<1x128xf32>
    %33 = vector.broadcast %32 : vector<1x128xf32> to vector<8x128xf32>
    %34 = arith.addf %31, %33 : vector<8x128xf32>
    %cst_12 = arith.constant 0.000000e+00 : f32
    %35 = vector.broadcast %cst_12 : f32 to vector<8x128xf32>
    %36 = arith.maximumf %34, %35 : vector<8x128xf32>
    %c0_13 = arith.constant 0 : index
    %c0_14 = arith.constant 0 : index
    %37 = vector.load %arg4[%c0_13, %c0_14] : memref<128x128xf32, #tpu.memory_space<vmem>>, vector<128x128xf32>
    %cst_15 = arith.constant dense<0.000000e+00> : vector<8x128xf32>
    %38 = tpu.matmul %36, %37, %cst_15 {dimension_numbers = #tpu.dot_dimension_numbers<[1], [0], [0], [1], [0, 0, 1, 1], [], []>} : vector<8x128xf32>, vector<128x128xf32>, vector<8x128xf32> -> vector<8x128xf32>
    %c0_16 = arith.constant 0 : index
    %c0_17 = arith.constant 0 : index
    %39 = vector.load %arg5[%c0_16, %c0_17] : memref<3x128xf32, #tpu.memory_space<vmem>>, vector<1x128xf32>
    %40 = vector.broadcast %39 : vector<1x128xf32> to vector<8x128xf32>
    %41 = arith.addf %38, %40 : vector<8x128xf32>
    %cst_18 = arith.constant dense<0.000000e+00> : vector<8xf32>
    %42 = vector.multi_reduction <add>, %41, %cst_18 [1] : vector<8x128xf32> to vector<8xf32>
    %43 = vector.shape_cast %42 : vector<8xf32> to vector<8x1xf32>
    %cst_19 = arith.constant 1.562500e-02 : f32
    %44 = vector.broadcast %cst_19 : f32 to vector<8x1xf32>
    %45 = arith.mulf %43, %44 : vector<8x1xf32>
    %46 = vector.broadcast %45 : vector<8x1xf32> to vector<8x128xf32>
    %47 = arith.subf %41, %46 : vector<8x128xf32>
    %48 = tpu.iota {dimensions = array<i32: 1>} : vector<1x128xi32>
    %c64_i32 = arith.constant 64 : i32
    %49 = vector.broadcast %c64_i32 : i32 to vector<1x128xi32>
    %50 = arith.cmpi slt, %48, %49 : vector<1x128xi32>
    %51 = arith.extui %50 : vector<1x128xi1> to vector<1x128xi32>
    %52 = arith.sitofp %51 : vector<1x128xi32> to vector<1x128xf32>
    %53 = vector.broadcast %52 : vector<1x128xf32> to vector<8x128xf32>
    %54 = arith.mulf %47, %53 : vector<8x128xf32>
    %55 = arith.mulf %54, %54 : vector<8x128xf32>
    %cst_20 = arith.constant dense<0.000000e+00> : vector<8xf32>
    %56 = vector.multi_reduction <add>, %55, %cst_20 [1] : vector<8x128xf32> to vector<8xf32>
    %57 = vector.shape_cast %56 : vector<8xf32> to vector<8x1xf32>
    %cst_21 = arith.constant 1.562500e-02 : f32
    %58 = vector.broadcast %cst_21 : f32 to vector<8x1xf32>
    %59 = arith.mulf %57, %58 : vector<8x1xf32>
    %cst_22 = arith.constant 9.99999974E-6 : f32
    %60 = vector.broadcast %cst_22 : f32 to vector<8x1xf32>
    %61 = arith.addf %59, %60 : vector<8x1xf32>
    %62 = math.rsqrt %61 : vector<8x1xf32>
    %63 = vector.broadcast %62 : vector<8x1xf32> to vector<8x128xf32>
    %64 = arith.mulf %54, %63 : vector<8x128xf32>
    %c1_23 = arith.constant 1 : index
    %c0_24 = arith.constant 0 : index
    %65 = vector.load %arg5[%c1_23, %c0_24] : memref<3x128xf32, #tpu.memory_space<vmem>>, vector<1x128xf32>
    %66 = vector.broadcast %65 : vector<1x128xf32> to vector<8x128xf32>
    %67 = arith.mulf %64, %66 : vector<8x128xf32>
    %c2_25 = arith.constant 2 : index
    %c0_26 = arith.constant 0 : index
    %68 = vector.load %arg5[%c2_25, %c0_26] : memref<3x128xf32, #tpu.memory_space<vmem>>, vector<1x128xf32>
    %69 = vector.broadcast %68 : vector<1x128xf32> to vector<8x128xf32>
    %70 = arith.addf %67, %69 : vector<8x128xf32>
    %cst_27 = arith.constant 0.000000e+00 : f32
    %71 = vector.broadcast %cst_27 : f32 to vector<8x128xf32>
    %72 = arith.maximumf %70, %71 : vector<8x128xf32>
    %c0_28 = arith.constant 0 : index
    %c0_29 = arith.constant 0 : index
    %73 = vector.load %arg6[%c0_28, %c0_29] : memref<128x128xf32, #tpu.memory_space<vmem>>, vector<128x128xf32>
    %cst_30 = arith.constant dense<0.000000e+00> : vector<8x128xf32>
    %74 = tpu.matmul %72, %73, %cst_30 {dimension_numbers = #tpu.dot_dimension_numbers<[1], [0], [0], [1], [0, 0, 1, 1], [], []>} : vector<8x128xf32>, vector<128x128xf32>, vector<8x128xf32> -> vector<8x128xf32>
    %c0_31 = arith.constant 0 : index
    %c0_32 = arith.constant 0 : index
    %75 = vector.load %arg7[%c0_31, %c0_32] : memref<3x128xf32, #tpu.memory_space<vmem>>, vector<1x128xf32>
    %76 = vector.broadcast %75 : vector<1x128xf32> to vector<8x128xf32>
    %77 = arith.addf %74, %76 : vector<8x128xf32>
    %c0_33 = arith.constant 0 : index
    %c0_34 = arith.constant 0 : index
    %78 = vector.load %arg8[%c0_33, %c0_34] : memref<8x128xf32, #tpu.memory_space<vmem>>, vector<8x128xf32>
    tpu.vector_store %arg8[%c0_33, %c0_34], %77 {strides = array<i32>} : memref<8x128xf32, #tpu.memory_space<vmem>>, vector<8x128xf32>,
    return
  }
  func.func @transform_0(%arg0: i32) -> (i32, i32) {
    %c0_i32 = arith.constant 0 : i32
    %c0_i32_0 = arith.constant 0 : i32
    return %arg0, %c0_i32 : i32, i32
  }
  func.func @transform_1(%arg0: i32) -> (i32, i32) {
    %c0_i32 = arith.constant 0 : i32
    %c0_i32_0 = arith.constant 0 : i32
    %c0_i32_1 = arith.constant 0 : i32
    return %c0_i32, %c0_i32_0 : i32, i32
  }
  func.func @transform_2(%arg0: i32) -> (i32, i32) {
    %c0_i32 = arith.constant 0 : i32
    %c0_i32_0 = arith.constant 0 : i32
    %c0_i32_1 = arith.constant 0 : i32
    return %c0_i32, %c0_i32_0 : i32, i32
  }
  func.func @transform_3(%arg0: i32) -> (i32, i32) {
    %c0_i32 = arith.constant 0 : i32
    %c0_i32_0 = arith.constant 0 : i32
    %c0_i32_1 = arith.constant 0 : i32
    return %c0_i32, %c0_i32_0 : i32, i32
  }
  func.func @transform_4(%arg0: i32) -> (i32, i32) {
    %c0_i32 = arith.constant 0 : i32
    %c0_i32_0 = arith.constant 0 : i32
    %c0_i32_1 = arith.constant 0 : i32
    return %c0_i32, %c0_i32_0 : i32, i32
  }
  func.func @transform_5(%arg0: i32) -> (i32, i32) {
    %c0_i32 = arith.constant 0 : i32
    %c0_i32_0 = arith.constant 0 : i32
    %c0_i32_1 = arith.constant 0 : i32
    return %c0_i32, %c0_i32_0 : i32, i32
  }
  func.func @transform_6(%arg0: i32) -> (i32, i32) {
    %c0_i32 = arith.constant 0 : i32
    %c0_i32_0 = arith.constant 0 : i32
    %c0_i32_1 = arith.constant 0 : i32
    return %c0_i32, %c0_i32_0 : i32, i32
  }
  func.func @transform_7(%arg0: i32) -> (i32, i32) {
    %c0_i32 = arith.constant 0 : i32
    %c0_i32_0 = arith.constant 0 : i32
    return %arg0, %c0_i32 : i32, i32
  }
}

</mosaic_0001>

<bundles_post_ra>
// kernel: tpu_custom_call.1
= control target key start
LH: loop header
LB: loop body
LE: loop exit
PB: predicated region body
PF: predicated region fallthrough
CT: control target
= control target key end

     0   :  { %12 = vsyncpa [#allocation3], 0  ;;  %s975_s0 = inlined_call_operand.hbm [shape: f32[8,128], index: 0, kind: input, shape index: {}]   ;;  %s976_s1 = inlined_call_operand.hbm [shape: f32[128,128], index: 1, kind: input, shape index: {}]   ;;  %s977_s2 = inlined_call_operand.vmem [shape: f32[3,128], index: 2, kind: input, shape index: {}]   ;;  %s978_s3 = inlined_call_operand.hbm [shape: f32[128,128], index: 3, kind: input, shape index: {}]   ;;  %s979_s4 = inlined_call_operand.vmem [shape: f32[3,128], index: 4, kind: input, shape index: {}]   ;;  %s980_s5 = inlined_call_operand.hbm [shape: f32[128,128], index: 5, kind: input, shape index: {}]   ;;  %s981_s6 = inlined_call_operand.vmem [shape: f32[3,128], index: 6, kind: input, shape index: {}]   ;;  %s982_s7 = inlined_call_operand.hbm [shape: f32[8,128], index: 7, kind: output, shape index: {}]  }
   0x1   :  { %13 = vsyncpa [#allocation6], 0 }
   0x2   :  { %14 = vsyncpa [#allocation9], 0 }
   0x3   :  { %15 = vsyncpa [#allocation4], 0  ;;  %s799_s24 = smov [#allocation5]   ;;  %s681_s28 = scalar_lea.hbm %s976_s1, 2048 }
   0x4   :  { %s31_s25 = sshll.u32 %s799_s24, 4  ;;  %p682_p0 = scmp.ne.s32.totalorder %s976_s1, %s681_s28  ;;  %s32_s25 = int_to_ptr.vmem [resolvable:$true] %s31_s25 }
   0x5   :  { %p685_p1 = scmp.lt.u32.totalorder %s681_s28, %s976_s1 }
   0x7   :  { %p687_p2 = pnand %p685_p1, %p682_p0 }
   0x9   :  { %690 = shalt.err (!%p687_p2)
}
   0xa   :  { %s691_s10 = scalar_lea.vmem %s32_s25, 2048  ;;  %p696_p4 = scmp.lt.s32.totalorder %s32_s25, %s32_s25 }
   0xb   :  { %p692_p3 = scmp.ne.s32.totalorder %s32_s25, %s691_s10  ;;  %p697_p5 = scmp.lt.s32.totalorder %s691_s10, %s691_s10 }
   0xd   :  { %p698_p6 = por %p697_p5, %p696_p4 }
   0xf   :  { %p699_p7 = pnand %p698_p6, %p692_p3 }
  0x11   :  { %702 = shalt.err (!%p699_p7)
}
  0x12   :  { %s800_s11 = smov 128   ;;  %s801_s12 = smov 8  }
  0x13   :  { %37 = dma.hbm_to_vmem [thread:$0]  %s976_s1, 2048, %s32_s25, [#allocation6], %s800_s11, %s800_s11, %s801_s12  }
  0x14   :  { %s802_s15 = smov [#allocation2]   ;;  %s803_s17 = smov [#allocation7]  }
  0x15   :  { %s22_s16 = sshll.u32 %s802_s15, 4  ;;  %s45_s18 = sshll.u32 %s803_s17, 4  ;;  %s23_s16 = int_to_ptr.vmem [resolvable:$true] %s22_s16  ;;  %s46_s18 = int_to_ptr.vmem [resolvable:$true] %s45_s18 }
  0x16   :  { %s703_s21 = scalar_lea.hbm %s975_s0, 128 }
  0x17   :  { %p704_p8 = scmp.ne.s32.totalorder %s975_s0, %s703_s21  ;;  %p707_p9 = scmp.lt.u32.totalorder %s703_s21, %s975_s0 }
  0x19   :  { %p709_p10 = pnand %p707_p9, %p704_p8 }
  0x1b   :  { %712 = shalt.err (!%p709_p10)
}
  0x1c   :  { %s713_s1 = scalar_lea.vmem %s23_s16, 128  ;;  %p718_p12 = scmp.lt.s32.totalorder %s23_s16, %s23_s16 }
  0x1d   :  { %p714_p11 = scmp.ne.s32.totalorder %s23_s16, %s713_s1  ;;  %p719_p13 = scmp.lt.s32.totalorder %s713_s1, %s713_s1 }
  0x1f   :  { %p720_p0 = por %p719_p13, %p718_p12 }
  0x21   :  { %p721_p1 = pnand %p720_p0, %p714_p11 }
  0x23   :  { %724 = shalt.err (!%p721_p1)
}
  0x24   :  { %25 = dma.hbm_to_vmem [thread:$0]  %s975_s0, 128, %s23_s16, [#allocation3]  }
  0x25   :  { %s725_s30 = scalar_lea.hbm %s978_s3, 2048 }
  0x26   :  { %p726_p2 = scmp.ne.s32.totalorder %s978_s3, %s725_s30  ;;  %p729_p3 = scmp.lt.u32.totalorder %s725_s30, %s978_s3 }
  0x28   :  { %p731_p4 = pnand %p729_p3, %p726_p2 }
  0x2a   :  { %734 = shalt.err (!%p731_p4)
}
  0x2b   :  { %s735_s14 = scalar_lea.vmem %s46_s18, 2048  ;;  %p740_p6 = scmp.lt.s32.totalorder %s46_s18, %s46_s18 }
  0x2c   :  { %p736_p5 = scmp.ne.s32.totalorder %s46_s18, %s735_s14  ;;  %p741_p7 = scmp.lt.s32.totalorder %s735_s14, %s735_s14 }
  0x2e   :  { %p742_p8 = por %p741_p7, %p740_p6 }
  0x30   :  { %p743_p9 = pnand %p742_p8, %p736_p5 }
  0x32   :  { %746 = shalt.err (!%p743_p9)
}
  0x33   :  { %51 = dma.hbm_to_vmem [thread:$0]  %s978_s3, 2048, %s46_s18, [#allocation6], %s800_s11, %s800_s11, %s801_s12  }
  0x34   :  { %s804_s16 = smov [#allocation8]   ;;  %s747_s21 = scalar_lea.hbm %s980_s5, 2048 }
  0x35   :  { %s59_s17 = sshll.u32 %s804_s16, 4  ;;  %p748_p10 = scmp.ne.s32.totalorder %s980_s5, %s747_s21  ;;  %s60_s17 = int_to_ptr.vmem [resolvable:$true] %s59_s17 }
  0x36   :  { %p751_p11 = scmp.lt.u32.totalorder %s747_s21, %s980_s5 }
  0x38   :  { %p753_p12 = pnand %p751_p11, %p748_p10 }
  0x3a   :  { %756 = shalt.err (!%p753_p12)
}
  0x3b   :  { %s757_s1 = scalar_lea.vmem %s60_s17, 2048  ;;  %p762_p0 = scmp.lt.s32.totalorder %s60_s17, %s60_s17 }
  0x3c   :  { %p758_p13 = scmp.ne.s32.totalorder %s60_s17, %s757_s1  ;;  %p763_p1 = scmp.lt.s32.totalorder %s757_s1, %s757_s1 }
  0x3e   :  { %p764_p2 = por %p763_p1, %p762_p0 }
  0x40   :  { %p765_p3 = pnand %p764_p2, %p758_p13 }
  0x42   :  { %768 = shalt.err (!%p765_p3)
}
  0x43   :  { %65 = dma.hbm_to_vmem [thread:$0]  %s980_s5, 2048, %s60_s17, [#allocation9], %s800_s11, %s800_s11, %s801_s12  }
  0x44   :  { %791 = dma.done.wait [#allocation3], 128  }
  0x45   :  { %792 = vsyncadd [#allocation3], 4294967168 }
  0x46   :  { %793 = dma.done.wait [#allocation6], 4096  }
  0x47   :  { %794 = vsyncadd [#allocation6], 4294963200 }
  0x48   :  { %795 = dma.done.wait [#allocation9], 2048  }
  0x49   :  { %796 = vsyncadd [#allocation9], 4294965248  ;;  %v805_v0 = vmov 0.0|0.0   ;;  %vm806_vm0 = vmmov 0   ;;  %v807_v1 = vmov 0.0   ;;  %v81_v2 = vld [vmem:[#allocation5] sm:$0xff]  ;;  %v176_v37 = vlaneseq }
  0x4a   :  { %595 = vmatprep.subr.bf16.mxu0 %v805_v0  ;;  %522 = vmatprep.mubr.msk.f32.mxu0 %vm806_vm0, %v807_v1  ;;  %v82_v3 = vld [vmem:[#allocation5 + $0x8] sm:$0xff]  ;;  %v83_v4 = vld [vmem:[#allocation5 + $0x10] sm:$0xff]  ;;  %v84_v6 = vld [vmem:[#allocation5 + $0x18] sm:$0xff]  ;;  %s808_s0 = smov [#allocation10]  }
  0x4b   :  { %619 = vmatprep.subr.bf16.mxu1 %v805_v0  ;;  %557 = vmatprep.mubr.msk.f32.mxu1 %vm806_vm0, %v807_v1  ;;  %v596_v5 = vpack.c.bf16 %v82_v3, %v81_v2  ;;  %v599_v7 = vpack.c.bf16 %v84_v6, %v83_v4  ;;  %v85_v8 = vld [vmem:[#allocation5 + $0x20] sm:$0xff]  ;;  %v86_v9 = vld [vmem:[#allocation5 + $0x28] sm:$0xff]  ;;  %v87_v11 = vld [vmem:[#allocation5 + $0x30] sm:$0xff]  ;;  %v927_v38 = vand.u32 127, %v176_v37  ;;  %s419_s15 = sshll.u32 %s808_s0, 4  ;;  %s420_s15 = int_to_ptr.vmem [resolvable:$true] %s419_s15 }
  0x4c   :  { %v602_v10 = vpack.c.bf16 %v86_v9, %v85_v8  ;;  %v88_v12 = vld [vmem:[#allocation5 + $0x38] sm:$0xff]  ;;  %v89_v14 = vld [vmem:[#allocation5 + $0x40] sm:$0xff]  ;;  %v90_v15 = vld [vmem:[#allocation5 + $0x48] sm:$0xff]  ;;  %s769_s16 = scalar_lea.vmem %s420_s15, 128  ;;  %p774_p5 = scmp.lt.s32.totalorder %s420_s15, %s420_s15 }
  0x4d   :  { %597 = vmatpush3.bf16.msra.mxu0 %v596_v5  ;;  %v605_v13 = vpack.c.bf16 %v88_v12, %v87_v11  ;;  %v608_v16 = vpack.c.bf16 %v90_v15, %v89_v14  ;;  %v91_v17 = vld [vmem:[#allocation5 + $0x50] sm:$0xff]  ;;  %v92_v18 = vld [vmem:[#allocation5 + $0x58] sm:$0xff]  ;;  %v93_v20 = vld [vmem:[#allocation5 + $0x60] sm:$0xff]  ;;  %vm178_vm1 = vcmp.lt.s32.totalorder %v927_v38, 32  ;;  %vm297_vm2 = vcmp.lt.s32.totalorder %v927_v38, 64  ;;  %p770_p4 = scmp.ne.s32.totalorder %s420_s15, %s769_s16  ;;  %p775_p6 = scmp.lt.s32.totalorder %s769_s16, %s769_s16 }
  0x4e   :  { %598 = vmatprep.subr.bf16.mxu0 %v805_v0  ;;  %v611_v19 = vpack.c.bf16 %v92_v18, %v91_v17  ;;  %v94_v21 = vld [vmem:[#allocation5 + $0x68] sm:$0xff]  ;;  %v95_v23 = vld [vmem:[#allocation5 + $0x70] sm:$0xff]  ;;  %v96_v24 = vld [vmem:[#allocation5 + $0x78] sm:$0xff]  ;;  %v431_v41 = vsel %vm178_vm1, 1.0, %v807_v1 }
  0x4f   :  { %v614_v22 = vpack.c.bf16 %v94_v21, %v93_v20  ;;  %v617_v25 = vpack.c.bf16 %v96_v24, %v95_v23  ;;  %v80_v26 = vld [vmem:[#allocation2] sm:$0xff]  ;;  %v202_v31 = vld [vmem:[#allocation7] sm:$0xff]  ;;  %v203_v32 = vld [vmem:[#allocation7 + $0x8] sm:$0xff]  ;;  %v435_v23 = vsel %vm297_vm2, 1.0, %v807_v1  ;;  %p776_p7 = por %p775_p6, %p774_p5 }
  0x50   :  { %v430_v27 = vld [vmem:[%s977_s2] ss:$0 sm:$0xff]  ;;  %v204_v33 = vld [vmem:[#allocation7 + $0x10] sm:$0xff]  ;;  %v620_v34 = vpack.c.bf16 %v203_v32, %v202_v31  ;;  %v206_v45 = vld [vmem:[#allocation7 + $0x20] sm:$0xff] }
  0x51   :  { %600 = vmatpush3.bf16.msra.mxu0 %v599_v7  ;;  %v205_v35 = vld [vmem:[#allocation7 + $0x18] sm:$0xff]  ;;  %v207_v46 = vld [vmem:[#allocation7 + $0x28] sm:$0xff]  ;;  %v208_v48 = vld [vmem:[#allocation7 + $0x30] sm:$0xff]  ;;  %p777_p8 = pnand %p776_p7, %p770_p4 }
  0x52   :  { %601 = vmatprep.subr.bf16.mxu0 %v805_v0  ;;  %621 = vmatpush3.bf16.msra.mxu1 %v620_v34  ;;  %v623_v36 = vpack.c.bf16 %v205_v35, %v204_v33  ;;  %v626_v47 = vpack.c.bf16 %v207_v46, %v206_v45  ;;  %v209_v49 = vld [vmem:[#allocation7 + $0x38] sm:$0xff]  ;;  %v210_v51 = vld [vmem:[#allocation7 + $0x40] sm:$0xff]  ;;  %v211_v52 = vld [vmem:[#allocation7 + $0x48] sm:$0xff] }
  0x53   :  { %622 = vmatprep.subr.bf16.mxu1 %v805_v0  ;;  %v629_v50 = vpack.c.bf16 %v209_v49, %v208_v48  ;;  %v632_v53 = vpack.c.bf16 %v211_v52, %v210_v51  ;;  %v212_v54 = vld [vmem:[#allocation7 + $0x50] sm:$0xff]  ;;  %v213_v55 = vld [vmem:[#allocation7 + $0x58] sm:$0xff]  ;;  %v214_v57 = vld [vmem:[#allocation7 + $0x60] sm:$0xff] }
  0x54   :  { %v635_v56 = vpack.c.bf16 %v213_v55, %v212_v54  ;;  %v215_v58 = vld [vmem:[#allocation7 + $0x68] sm:$0xff]  ;;  %v216_v60 = vld [vmem:[#allocation7 + $0x70] sm:$0xff]  ;;  %v217_v61 = vld [vmem:[#allocation7 + $0x78] sm:$0xff] }
  0x55   :  { %603 = vmatpush3.bf16.msra.mxu0 %v602_v10  ;;  %v638_v59 = vpack.c.bf16 %v215_v58, %v214_v57  ;;  %v641_v62 = vpack.c.bf16 %v217_v61, %v216_v60  ;;  %v432_v5 = vld [vmem:[%s977_s2 + $0x1] ss:$0 sm:$0xff]  ;;  %v433_v7 = vld [vmem:[%s977_s2 + $0x2] ss:$0 sm:$0xff]  ;;  %v434_v11 = vld [vmem:[%s979_s4] ss:$0 sm:$0xff] }
  0x56   :  { %604 = vmatprep.subr.bf16.mxu0 %v805_v0  ;;  %624 = vmatpush3.bf16.msra.mxu1 %v623_v36  ;;  %v321_v15 = vld [vmem:[#allocation8] sm:$0xff]  ;;  %v323_v17 = vld [vmem:[#allocation8 + $0x10] sm:$0xff]  ;;  %v328_v31 = vld [vmem:[#allocation8 + $0x38] sm:$0xff] }
  0x57   :  { %625 = vmatprep.subr.bf16.mxu1 %v805_v0  ;;  %v329_v33 = vld [vmem:[#allocation8 + $0x40] sm:$0xff]  ;;  %v330_v34 = vld [vmem:[#allocation8 + $0x48] sm:$0xff]  ;;  %v332_v36 = vld [vmem:[#allocation8 + $0x58] sm:$0xff] }
  0x58   :  { %v656_v35 = vpack.c.bf16 %v330_v34, %v329_v33  ;;  %v333_v38 = vld [vmem:[#allocation8 + $0x60] sm:$0xff]  ;;  %v436_v48 = vld [vmem:[%s979_s4 + $0x1] ss:$0 sm:$0xff] }
  0x59   :  { %606 = vmatpush3.bf16.msra.mxu0 %v605_v13 }
  0x5a   :  { %607 = vmatprep.subr.bf16.mxu0 %v805_v0  ;;  %627 = vmatpush3.bf16.msra.mxu1 %v626_v47 }
  0x5b   :  { %628 = vmatprep.subr.bf16.mxu1 %v805_v0 }
  0x5d   :  { %609 = vmatpush3.bf16.msra.mxu0 %v608_v16  ;;  %v322_v16 = vld [vmem:[#allocation8 + $0x8] sm:$0xff] }
  0x5e   :  { %610 = vmatprep.subr.bf16.mxu0 %v805_v0  ;;  %630 = vmatpush3.bf16.msra.mxu1 %v629_v50  ;;  %v644_v18 = vpack.c.bf16 %v322_v16, %v321_v15  ;;  %v437_v50 = vld [vmem:[%s979_s4 + $0x2] ss:$0 sm:$0xff] }
  0x5f   :  { %631 = vmatprep.subr.bf16.mxu1 %v805_v0 }
  0x61   :  { %612 = vmatpush3.bf16.msra.mxu0 %v611_v19  ;;  %v324_v19 = vld [vmem:[#allocation8 + $0x18] sm:$0xff] }
  0x62   :  { %613 = vmatprep.subr.bf16.mxu0 %v805_v0  ;;  %633 = vmatpush3.bf16.msra.mxu1 %v632_v53  ;;  %v647_v20 = vpack.c.bf16 %v324_v19, %v323_v17 }
  0x63   :  { %634 = vmatprep.subr.bf16.mxu1 %v805_v0 }
  0x65   :  { %615 = vmatpush3.bf16.msra.mxu0 %v614_v22 }
  0x66   :  { %616 = vmatprep.subr.bf16.mxu0 %v805_v0  ;;  %636 = vmatpush3.bf16.msra.mxu1 %v635_v56 }
  0x67   :  { %637 = vmatprep.subr.bf16.mxu1 %v805_v0 }
  0x69   :  { %618 = vmatpush3.bf16.msra.mxu0 %v617_v25 }
  0x6a   :  { %643 = vmatprep.subr.bf16.mxu0 %v805_v0  ;;  %639 = vmatpush3.bf16.msra.mxu1 %v638_v59 }
  0x6b   :  { %640 = vmatprep.subr.bf16.mxu1 %v805_v0 }
  0x6c   :  { %523 = vmatmul.mubr.f32.vlgmr.msra.gmra.mrb[0].mxu0 %v80_v26 }
  0x6d   :  { %592 = vmatprep.mubr.msk.f32.mxu0 %vm806_vm0, %v807_v1  ;;  %645 = vmatpush3.bf16.msra.mxu0 %v644_v18  ;;  %v331_v1 = vld [vmem:[#allocation8 + $0x50] sm:$0xff] }
  0x6e   :  { %642 = vmatpush3.bf16.msra.mxu1 %v641_v62  ;;  %646 = vmatprep.subr.bf16.mxu0 %v805_v0  ;;  %v659_v37 = vpack.c.bf16 %v332_v36, %v331_v1 }
  0x71   :  { %648 = vmatpush3.bf16.msra.mxu0 %v647_v20 }
  0x72   :  { %649 = vmatprep.subr.bf16.mxu0 %v805_v0 }
 0x13f   :  { %v168_v28 = vpop.f32.mrb[0].mxu0 }
 0x140   :  { %v169_v29 = vadd.f32 %v430_v27, %v168_v28  ;;  %v524_v30 = vpop.f32.mrb[1].mxu0  ;;  %v325_v27 = vld [vmem:[#allocation8 + $0x20] sm:$0xff]  ;;  %v326_v28 = vld [vmem:[#allocation8 + $0x28] sm:$0xff] }
 0x141   :  { %v327_v30 = vld [vmem:[#allocation8 + $0x30] sm:$0xff] }
 0x142   :  { %172 = vadd.xlane.f32.xlu0 %v169_v29  ;;  %v653_v32 = vpack.c.bf16 %v328_v31, %v327_v30 }
 0x1cf   :  { %v173_v39 = vpop.xlane.xlu0 %172 }
 0x1d0   :  { %v174_v40 = vmul.f32 0.03125, %v173_v39  ;;  %v334_v39 = vld [vmem:[#allocation8 + $0x68] sm:$0xff] }
 0x1d2   :  { %v175_v42 = vsub.f32 %v169_v29, %v174_v40  ;;  %v650_v29 = vpack.c.bf16 %v326_v28, %v325_v27  ;;  %v662_v40 = vpack.c.bf16 %v334_v39, %v333_v38 }
 0x1d4   :  { %v181_v43 = vmul.f32 %v431_v41, %v175_v42  ;;  %651 = vmatpush3.bf16.msra.mxu0 %v650_v29  ;;  %v335_v41 = vld [vmem:[#allocation8 + $0x70] sm:$0xff]  ;;  %v336_v42 = vld [vmem:[#allocation8 + $0x78] sm:$0xff] }
 0x1d5   :  { %652 = vmatprep.subr.bf16.mxu0 %v805_v0 }
 0x1d6   :  { %v182_v44 = vmul.f32 %v181_v43, %v181_v43 }
 0x1d8   :  { %183 = vadd.xlane.f32.xlu0 %v182_v44  ;;  %654 = vmatpush3.bf16.msra.mxu0 %v653_v32 }
 0x1d9   :  { %655 = vmatprep.subr.bf16.mxu0 %v805_v0 }
 0x1dc   :  { %657 = vmatpush3.bf16.msra.mxu0 %v656_v35 }
 0x1dd   :  { %658 = vmatprep.subr.bf16.mxu0 %v805_v0 }
 0x1e0   :  { %660 = vmatpush3.bf16.msra.mxu0 %v659_v37 }
 0x1e1   :  { %661 = vmatprep.subr.bf16.mxu0 %v805_v0 }
 0x1e4   :  { %663 = vmatpush3.bf16.msra.mxu0 %v662_v40 }
 0x1e5   :  { %664 = vmatprep.subr.bf16.mxu0 %v805_v0  ;;  %v438_v0 = vld [vmem:[%s981_s6] ss:$0 sm:$0xff] }
 0x265   :  { %v184_v63 = vpop.xlane.xlu0 %183 }
 0x266   :  { %v185_v2 = vmul.f32 0.03125, %v184_v63 }
 0x268   :  { %v186_v3 = vadd.f32 1e-05, %v185_v2 }
 0x26a   :  { %677 = vrsqrt.f32 %v186_v3 }
 0x274   :  { %v678_v4 = vpop.eup %677 }
 0x275   :  { %v188_v6 = vmul.f32 %v678_v4, %v181_v43  ;;  %v665_v43 = vpack.c.bf16 %v336_v42, %v335_v41 }
 0x277   :  { %v194_v8 = vmul.f32 %v432_v5, %v188_v6  ;;  %666 = vmatpush3.bf16.msra.mxu0 %v665_v43 }
 0x279   :  { %v200_v9 = vadd.f32 %v433_v7, %v194_v8 }
 0x27b   :  { %v201_v10 = vmax.f32 %v200_v9, 0.0 }
 0x27d   :  { %558 = vmatmul.mubr.f32.vlgmr.msra.gmra.mrb[0].mxu1 %v201_v10 }
 0x350   :  { %v289_v12 = vpop.f32.mrb[0].mxu1 }
 0x351   :  { %v290_v13 = vadd.f32 %v434_v11, %v289_v12  ;;  %v559_v14 = vpop.f32.mrb[1].mxu1 }
 0x353   :  { %293 = vadd.xlane.f32.xlu1 %v290_v13 }
 0x3e0   :  { %v294_v21 = vpop.xlane.xlu1 %293 }
 0x3e1   :  { %v295_v22 = vmul.f32 0.015625, %v294_v21 }
 0x3e3   :  { %v296_v24 = vsub.f32 %v290_v13, %v295_v22 }
 0x3e5   :  { %v300_v25 = vmul.f32 %v435_v23, %v296_v24 }
 0x3e7   :  { %v301_v26 = vmul.f32 %v300_v25, %v300_v25 }
 0x3e9   :  { %302 = vadd.xlane.f32.xlu1 %v301_v26 }
 0x476   :  { %v303_v44 = vpop.xlane.xlu1 %302 }
 0x477   :  { %v304_v45 = vmul.f32 0.015625, %v303_v44 }
 0x479   :  { %v305_v46 = vadd.f32 1e-05, %v304_v45 }
 0x47b   :  { %679 = vrsqrt.f32 %v305_v46 }
 0x485   :  { %v680_v47 = vpop.eup %679 }
 0x486   :  { %v307_v49 = vmul.f32 %v680_v47, %v300_v25 }
 0x488   :  { %v313_v51 = vmul.f32 %v436_v48, %v307_v49 }
 0x48a   :  { %v319_v52 = vadd.f32 %v437_v50, %v313_v51 }
 0x48c   :  { %v320_v53 = vmax.f32 %v319_v52, 0.0 }
 0x48e   :  { %593 = vmatmul.mubr.f32.vlgmr.msra.gmra.mrb[2].mxu0 %v320_v53 }
 0x561   :  { %v408_v54 = vpop.f32.mrb[2].mxu0 }
 0x562   :  { %v409_v55 = vadd.f32 %v438_v0, %v408_v54  ;;  %v594_v56 = vpop.f32.mrb[3].mxu0 }
 0x564   :  { %412 = vst [vmem:[#allocation10] sm:$0xff] %v409_v55 }
 0x565   :  { %780 = shalt.err (!%p777_p8)
}
 0x566   :  { %s781_s19 = scalar_lea.hbm %s982_s7, 128 }
 0x567   :  { %p782_p9 = scmp.ne.s32.totalorder %s982_s7, %s781_s19  ;;  %p785_p10 = scmp.lt.u32.totalorder %s781_s19, %s982_s7 }
 0x569   :  { %p787_p11 = pnand %p785_p10, %p782_p9 }
 0x56b   :  { %790 = shalt.err (!%p787_p11)
}
 0x56c   :  { %422 = dma.vmem_to_hbm [thread:$0]  %s420_s15, 128, %s982_s7, [#allocation4]  }
 0x56d   :  { %797 = dma.done.wait [#allocation4], 128  }
 0x56e   :  { %798 = vsyncadd [#allocation4], 4294967168 }
 0x56f   :  { %426 = vsyncpa [#allocation3], 1 }
 0x570   :  { %427 = vsyncpa [#allocation6], 1 }
 0x571   :  { %428 = vsyncpa [#allocation9], 1 }
 0x572   :  { %429 = vsyncpa [#allocation4], 1 }

</bundles_post_ra>
